<compile_context>
chip_gen: v5e
topology: v5e:2x2
jax: 0.10.0
libtpu: 0.0.40
codegen_flags: <defaults>
</compile_context>

<pallas_src>
import jax
import jax.numpy as jnp
from jax.experimental import pallas as pl
from jax.experimental.pallas import tpu as pltpu


# -----------------------------------------------------------------------------
# PyTorch-style size resolution (single -1 allowed).
# -----------------------------------------------------------------------------
def _resolve_size(size, numel):
    size = list(size)
    if size.count(-1) > 1:
        raise ValueError("only one dimension can be inferred (-1)")
    if -1 in size:
        known = 1
        for s in size:
            if s != -1:
                known *= s
        if known == 0 or numel % known != 0:
            raise ValueError(f"cannot view {numel} elements as {size}")
        size[size.index(-1)] = numel // known
    total = 1
    for s in size:
        total *= s
    if total != numel:
        raise ValueError(f"view size {size} incompatible with {numel} elements")
    return tuple(size)


# -----------------------------------------------------------------------------
# Primary materializing engine: chunked direct HBM -> HBM DMA copy.
# -----------------------------------------------------------------------------
_CHUNK_BYTES = 8 * 1024 * 1024   # per-DMA payload (amortizes DMA issue cost)
_MAX_INFLIGHT = 4                # concurrent chunk DMAs in flight


def _make_dma_copy_kernel(n_chunks, chunk_elems, tail_elems):
    n_prime = min(_MAX_INFLIGHT, n_chunks)

    def kernel(x_ref, o_ref, sems):
        def chunk_copy(i, slot):
            start = pl.multiple_of(i * chunk_elems, chunk_elems)
            return pltpu.make_async_copy(
                x_ref.at[pl.ds(start, chunk_elems)],
                o_ref.at[pl.ds(start, chunk_elems)],
                sems.at[slot],
            )

        # Ragged tail: one extra DMA inside the SAME kernel (no pre-slice /
        # jnp.concatenate HBM round-trips).  Start it first so it overlaps
        # with the main chunk stream.
        tail = None
        if tail_elems:
            tail_start = n_chunks * chunk_elems
            tail = pltpu.make_async_copy(
                x_ref.at[pl.ds(tail_start, tail_elems)],
                o_ref.at[pl.ds(tail_start, tail_elems)],
                sems.at[_MAX_INFLIGHT],
            )
            tail.start()

        if n_chunks > 0:
            # Prime: put up to _MAX_INFLIGHT chunk DMAs in flight.
            for i in range(n_prime):          # static, tiny unroll
                chunk_copy(i, i).start()

            @pl.loop(0, n_chunks)
            def _(i):
                slot = i % n_prime
                chunk_copy(i, slot).wait()

                @pl.when(i + n_prime < n_chunks)
                def _():
                    chunk_copy(i + n_prime, slot).start()

        if tail is not None:
            tail.wait()

    return kernel


def _dma_copy_flat(flat, chunk_bytes=_CHUNK_BYTES):
    """Identity-copy a 1-D array via direct HBM->HBM DMAs (no VMEM staging)."""
    numel = flat.shape[0]
    dtype = flat.dtype
    itemsize = jnp.dtype(dtype).itemsize
    chunk_elems = max(1, chunk_bytes // itemsize)
    n_chunks = numel // chunk_elems
    tail_elems = numel - n_chunks * chunk_elems

    return pl.pallas_call(
        _make_dma_copy_kernel(n_chunks, chunk_elems, tail_elems),
        out_shape=jax.ShapeDtypeStruct((numel,), dtype),
        in_specs=[pl.BlockSpec(memory_space=pl.ANY)],
        out_specs=pl.BlockSpec(memory_space=pl.ANY),
        scratch_shapes=[pltpu.SemaphoreType.DMA((_MAX_INFLIGHT + 1,))],
        compiler_params=pltpu.CompilerParams(has_side_effects=True),
    )(flat)


_DIRECT_DMA_OK = None


def _direct_dma_available():
    """One-time self-checking probe for local HBM->HBM DMA support."""
    global _DIRECT_DMA_OK
    if _DIRECT_DMA_OK is None:
        try:
            probe = jnp.arange(1000, dtype=jnp.float32)
            # Tiny chunk so the probe exercises priming, the steady-state
            # loop, dynamic semaphore slots AND the ragged tail DMA.
            got = jax.block_until_ready(_dma_copy_flat(probe, chunk_bytes=1024))
            _DIRECT_DMA_OK = bool(jnp.array_equal(got, probe))
        except Exception:
            _DIRECT_DMA_OK = False
    return _DIRECT_DMA_OK


# -----------------------------------------------------------------------------
# Fallback materializing engine: staged VMEM copy (proven path), with
# generation-aware block sizing per the perf review.
# -----------------------------------------------------------------------------
def _copy_kernel(x_ref, o_ref):
    o_ref[...] = x_ref[...]


def _staged_block_params():
    """(target_block_bytes, vmem_limit_bytes), generation aware."""
    try:
        info = pltpu.get_tpu_info()
        vmem_cap = getattr(info, "vmem_capacity_bytes", 64 * 1024 * 1024)
    except Exception:
        vmem_cap = 64 * 1024 * 1024
    if vmem_cap >= 100 * 1024 * 1024:
        # v5e / v6e (128 MiB physical VMEM): 8 MiB blocks, 32 MiB live.
        return 8 * 1024 * 1024, 64 * 1024 * 1024
    # v7x (64 MiB physical VMEM): 4 MiB blocks, 16 MiB live, headroom kept.
    return 4 * 1024 * 1024, 28 * 1024 * 1024


def _pallas_copy_small(flat2d):
    """Single full-extent-block copy for small slabs (block == array dims)."""
    rows, cols = flat2d.shape
    return pl.pallas_call(
        _copy_kernel,
        out_shape=jax.ShapeDtypeStruct((rows, cols), flat2d.dtype),
        grid=(1,),
        in_specs=[pl.BlockSpec((rows, cols), lambda i: (0, 0))],
        out_specs=pl.BlockSpec((rows, cols), lambda i: (0, 0)),
    )(flat2d)


def _staged_copy_flat(flat):
    """Fallback: tiled, double-buffered VMEM-staged identity copy."""
    numel = flat.shape[0]
    dtype = flat.dtype
    itemsize = jnp.dtype(dtype).itemsize
    pack = max(8, 32 // max(1, itemsize))   # sublanes per vreg for this dtype

    if numel < 128:
        return _pallas_copy_small(flat.reshape(1, numel)).reshape(numel)

    main_elems = (numel // 128) * 128
    tail_elems = numel - main_elems

    cols = 128
    for c in (4096, 2048, 1024, 512, 256, 128):
        if main_elems % c == 0 and main_elems // c >= pack:
            cols = c
            break
    else:
        for c in (4096, 2048, 1024, 512, 256, 128):
            if main_elems % c == 0:
                cols = c
                break
    rows = main_elems // cols

    target_block_bytes, vmem_limit = _staged_block_params()
    tile_rows = max(pack, (target_block_bytes // (cols * itemsize)) // pack * pack)
    if rows >= 2 * pack:
        tile_rows = min(tile_rows, max(pack, (rows // 2) // pack * pack))
    if tile_rows >= rows:
        tile_rows = rows
    grid = (pl.cdiv(rows, tile_rows),)

    main = pl.pallas_call(
        _copy_kernel,
        out_shape=jax.ShapeDtypeStruct((rows, cols), dtype),
        grid_spec=pltpu.PrefetchScalarGridSpec(
            num_scalar_prefetch=0,
            grid=grid,
            in_specs=[pl.BlockSpec((tile_rows, cols), lambda i: (i, 0))],
            out_specs=pl.BlockSpec((tile_rows, cols), lambda i: (i, 0)),
        ),
        compiler_params=pltpu.CompilerParams(
            dimension_semantics=("parallel",),
            vmem_limit_bytes=vmem_limit,
        ),
    )(flat[:main_elems].reshape(rows, cols))

    parts = [main.reshape(main_elems)]
    if tail_elems:
        tail = _pallas_copy_small(
            flat[main_elems:].reshape(1, tail_elems)
        ).reshape(tail_elems)
        parts.append(tail)
    return parts[0] if len(parts) == 1 else jnp.concatenate(parts)


# -----------------------------------------------------------------------------
# Public API mirroring the PyTorch module.
# -----------------------------------------------------------------------------
def view_pallas(x, size, materialize=False):
    """Equivalent of `tensor.view(size)`.

    Default is metadata-only (a free row-major reshape — exactly what torch
    `.view` is on a contiguous tensor; JAX arrays are always contiguous).
    Set `materialize=True` to force a real copy of the bytes on TPU.
    """
    out_shape = _resolve_size(size, x.size)
    if not materialize:
        return x.reshape(out_shape)          # zero HBM traffic: optimal view
    flat = x.reshape(-1)
    if flat.size == 0:
        return flat.reshape(out_shape)
    if _direct_dma_available():
        out_flat = _dma_copy_flat(flat)      # 1x read + 1x write, any size
    else:
        out_flat = _staged_copy_flat(flat)   # proven staged fallback
    return out_flat.reshape(out_shape)


class ViewPallas:
    """Mirror of the PyTorch View module."""

    def __init__(self, size, materialize=False):
        self.size = size
        self.materialize = materialize

    def __call__(self, tensor):
        return view_pallas(tensor, self.size, materialize=self.materialize)


if __name__ == "__main__":
    key = jax.random.PRNGKey(0)

    # Small NCHW input consistent with LeNet-style usage: flatten conv
    # features before a linear layer, i.e. View((-1, C*H*W)).
    N, C, H, W = 2, 4, 16, 16
    x = jax.random.normal(key, (N, C, H, W), dtype=jnp.float32)
    ref = x.reshape(N, C * H * W)

    # 1) Default (recommended) path: metadata-only view, zero HBM traffic.
    mod = ViewPallas((-1, C * H * W))
    y = jax.block_until_ready(mod(x))
    assert y.shape == (N, C * H * W), y.shape
    assert y.dtype == x.dtype
    assert jnp.array_equal(y, ref)

    # 2) Materializing path: exercises the Pallas copy kernel on TPU.
    mod_copy = ViewPallas((-1, C * H * W), materialize=True)
    y2 = jax.block_until_ready(mod_copy(x))
    assert y2.shape == (N, C * H * W)
    assert jnp.array_equal(y2, ref)

    # 3) bf16 case through the materializing kernel.
    xb = x.astype(jnp.bfloat16)
    yb = jax.block_until_ready(view_pallas(xb, (N, C * H * W), materialize=True))
    assert yb.shape == (N, C * H * W)
    assert jnp.array_equal(yb, xb.reshape(N, C * H * W))

    # 4) Element count not divisible by 128: single-kernel ragged handling.
    xo = jax.random.normal(key, (5, 130), dtype=jnp.float32)  # 650 elements
    yo = jax.block_until_ready(view_pallas(xo, (-1,), materialize=True))
    assert yo.shape == (650,)
    assert jnp.array_equal(yo, xo.reshape(-1))

    print("KERNEL_OK")
</pallas_src>

<mosaic_0001>
module attributes {stable_mosaic.version = 11 : i64} {
  func.func @_copy_kernel(%arg0: i32, %arg1: memref<8x256xf32, #tpu.memory_space<vmem>>, %arg2: memref<8x256xf32, #tpu.memory_space<vmem>>) attributes {dimension_semantics = [#tpu.dimension_semantics<parallel>], iteration_bounds = array<i64: 1>, scalar_prefetch = 0 : i64, scratch_operands = 0 : i64, tpu.core_type = #tpu.core_type<tc>, window_params = [{transform_indices = @transform_0, window_bounds = array<i64: 8, 256>}, {transform_indices = @transform_1, window_bounds = array<i64: 8, 256>}]} {
    %c0 = arith.constant 0 : index
    %c0_0 = arith.constant 0 : index
    %0 = vector.load %arg1[%c0, %c0_0] : memref<8x256xf32, #tpu.memory_space<vmem>>, vector<8x256xf32>
    %c0_1 = arith.constant 0 : index
    %c0_2 = arith.constant 0 : index
    %1 = vector.load %arg2[%c0_1, %c0_2] : memref<8x256xf32, #tpu.memory_space<vmem>>, vector<8x256xf32>
    tpu.vector_store %arg2[%c0_1, %c0_2], %0 {strides = array<i32>} : memref<8x256xf32, #tpu.memory_space<vmem>>, vector<8x256xf32>,
    return
  }
  func.func @transform_0(%arg0: i32) -> (i32, i32) {
    %c0_i32 = arith.constant 0 : i32
    %c0_i32_0 = arith.constant 0 : i32
    return %arg0, %c0_i32 : i32, i32
  }
  func.func @transform_1(%arg0: i32) -> (i32, i32) {
    %c0_i32 = arith.constant 0 : i32
    %c0_i32_0 = arith.constant 0 : i32
    return %arg0, %c0_i32 : i32, i32
  }
}

</mosaic_0001>

<bundles_post_ra>
// kernel: tpu_custom_call.1
= control target key start
LH: loop header
LB: loop body
LE: loop exit
PB: predicated region body
PF: predicated region fallthrough
CT: control target
= control target key end

     0   :  { %6 = vsyncpa [#allocation3], 0  ;;  %s116_s0 = inlined_call_operand.hbm [shape: f32[8,256], index: 0, kind: input, shape index: {}]   ;;  %s117_s1 = inlined_call_operand.hbm [shape: f32[8,256], index: 1, kind: output, shape index: {}]  }
   0x1   :  { %7 = vsyncpa [#allocation4], 0  ;;  %s13_s8 = sshll.u32 %s116_s0, 4  ;;  %s98_s9 = smov [#allocation2]   ;;  %s14_s8 = int_to_ptr.hbm [resolvable:$true] %s13_s8 }
   0x2   :  { %s15_s10 = sshll.u32 %s98_s9, 4  ;;  %s16_s10 = int_to_ptr.vmem [resolvable:$true] %s15_s10 }
   0x3   :  { %18 = dma.hbm_to_vmem [thread:$0]  %s14_s8, 256, %s16_s10, [#allocation3]  }
   0x4   :  { %94 = dma.done.wait [#allocation3], 256  }
   0x5   :  { %95 = vsyncadd [#allocation3], 4294967040  ;;  %s99_s11 = smov [#allocation5]   ;;  %s34_s15 = sshll.u32 %s117_s1, 4  ;;  %v23_v0 = vld [vmem:[#allocation2] sm:$0xff]  ;;  %v24_v1 = vld [vmem:[#allocation2 + $0x8] sm:$0xff]  ;;  %s35_s15 = int_to_ptr.hbm [resolvable:$true] %s34_s15 }
   0x6   :  { %s32_s12 = sshll.u32 %s99_s11, 4  ;;  %25 = vst [vmem:[#allocation5] sm:$0xff] %v23_v0  ;;  %s33_s12 = int_to_ptr.vmem [resolvable:$true] %s32_s12 }
   0x7   :  { %26 = vst [vmem:[#allocation5 + $0x8] sm:$0xff] %v24_v1 }
   0x8   :  { %37 = dma.vmem_to_hbm [thread:$0]  %s33_s12, 256, %s35_s15, [#allocation4]  }
   0x9   :  { %96 = dma.done.wait [#allocation4], 256  }
   0xa   :  { %97 = vsyncadd [#allocation4], 4294967040 }
   0xb   :  { %42 = vsyncpa [#allocation3], 1 }
   0xc   :  { %43 = vsyncpa [#allocation4], 1 }

</bundles_post_ra>
